<compile_context>
chip_gen: v6e
topology: v6e:2x2x1
jax: 0.10.0
libtpu: 0.0.40
codegen_flags: <defaults>
</compile_context>

<pallas_src>
from functools import partial

import jax
import jax.numpy as jnp
from jax.experimental import pallas as pl
from jax.experimental.pallas import tpu as pltpu

# ----------------------------- model sizes -----------------------------
HID = 32                 # hidden width of every MLP
LAT = 32                 # latent_dim of both encoders
LEADS = 4                # ECG channels
SEQ = 8                  # ECG sequence length
ECG_F = LEADS * SEQ      # flattened ECG features (32)

HF = 2 * HID             # 64 fused hidden width   [h_pde | h_ecg]
ZF = 2 * LAT             # 64 fused latent width   [z_pde | z_ecg]
OUT_W = 8                # padded decoder output lanes (cols 0:2 are real)

# weight-slab row layout (all regions start at 8-aligned rows, 128 lanes wide)
_W1C_ROW = 0                     # rows   0:3   coords -> hidden   (3, HF), cols 0:HID
_W1E_ROW = 8                     # rows   8:40  ecg    -> hidden   (ECG_F, HF), cols HID:HF
_W2_ROW = 40                     # rows  40:104 fused hidden -> latent, block-diag (HF, ZF)
_W1D_ROW = 104                   # rows 104:136 decoder layer 1    (LAT, HID)
_W2D_ROW = 136                   # rows 136:168 decoder layer 2    (HID, OUT_W), cols 0:2
W_ROWS = 168
B_ROWS = 8                       # bias slab rows (4 used, padded to 8)


def _softplus(x):
    # matches torch.nn.functional.softplus numerically: log(1 + exp(x))
    return jnp.logaddexp(jnp.zeros_like(x), x)


def _round_up(n, m):
    return (n + m - 1) // m * m


# ----------------------------- kernel -----------------------------
def pinn_fused_kernel(coords_ref, ecg_ref, w_ref, b_ref, out_ref):
    f32 = jnp.float32

    coords = coords_ref[...]                                 # (TB, 3)
    ecg = ecg_ref[...]                                       # (TB, ECG_F)

    # static slices of the resident weight/bias slabs
    w1c = w_ref[_W1C_ROW:_W1C_ROW + 3, 0:HF]                 # (3, 64)  cols 0:32 real
    w1e = w_ref[_W1E_ROW:_W1E_ROW + ECG_F, 0:HF]             # (32, 64) cols 32:64 real
    w2 = w_ref[_W2_ROW:_W2_ROW + HF, 0:ZF]                   # (64, 64) block-diag
    w1d = w_ref[_W1D_ROW:_W1D_ROW + LAT, 0:HID]              # (32, 32)
    w2d = w_ref[_W2D_ROW:_W2D_ROW + HID, 0:OUT_W]            # (32, 8)  cols 0:2 real

    b1 = b_ref[0:1, 0:HF]                                    # (1, 64)
    b2 = b_ref[1:2, 0:ZF]                                    # (1, 64)
    b1d = b_ref[2:3, 0:HID]                                  # (1, 32)
    b2d = b_ref[3:4, 0:OUT_W]                                # (1, 8)

    # fused encoder layer 1: [tanh(coords@W1p+b1p) | tanh(ecg@W1e+b1e)]
    # (two MXU pushes summed == single block-diagonal matmul, bit-identical)
    h1 = jnp.tanh(jnp.dot(coords, w1c, preferred_element_type=f32)
                  + jnp.dot(ecg, w1e, preferred_element_type=f32)
                  + b1)                                       # (TB, 64)
    # fused encoder layer 2: [z_pde | z_ecg]
    zz = jnp.dot(h1, w2, preferred_element_type=f32) + b2     # (TB, 64)

    # fusion: z_pde * z_ecg (no `fuse` module => elementwise product)
    z_fused = zz[:, 0:LAT] * zz[:, LAT:ZF]                    # (TB, 32)

    # decoder
    hd = jnp.tanh(jnp.dot(z_fused, w1d, preferred_element_type=f32) + b1d)
    out8 = jnp.dot(hd, w2d, preferred_element_type=f32) + b2d  # (TB, 8)

    # transpose to a lane-dense (2, TB) output: softplus only on the 2 real rows,
    # writeback is 8 B/row instead of 512 B/row.
    out_t = out8.T                                            # (8, TB)
    out_ref[...] = _softplus(out_t[0:2, :])                   # (2, TB)


# ----------------------------- wrapper -----------------------------
@partial(jax.jit, static_argnames=("block_b",))
def cached_pinn_forward(x, y, z, ecg, w_slab, b_slab, sim_ids=None, block_b=1024):
    """x, y, z: (B,1) f32; ecg: (B, LEADS, SEQ) f32 (NCW). Returns (T, c), each (B,1).

    TODO(synk): sim_ids-based ECG-encoding caching is host-side Python state;
    only the uncached (sim_ids=None) path is implemented here.
    """
    del sim_ids
    B = x.shape[0]

    coords = jnp.concatenate([x, y, z], axis=-1).astype(jnp.float32)   # (B, 3)
    ecg_flat = ecg.reshape(B, -1).astype(jnp.float32)                  # (B, ECG_F)

    # Batch tile: multiple of 128 (keeps the transposed (2, tb) output block
    # lane-dense), >= 2 grid steps when the batch is large enough so v7x's two
    # TensorCores both get work, capped by block_b.
    block_b = max(128, _round_up(block_b, 128))
    tb = min(block_b, _round_up(pl.cdiv(B, 2), 128))
    b_pad = _round_up(B, tb)

    if b_pad != B:
        coords = jnp.pad(coords, ((0, b_pad - B), (0, 0)))
        ecg_flat = jnp.pad(ecg_flat, ((0, b_pad - B), (0, 0)))

    out = pl.pallas_call(
        pinn_fused_kernel,
        out_shape=jax.ShapeDtypeStruct((2, b_pad), jnp.float32),
        grid=(b_pad // tb,),
        in_specs=[
            pl.BlockSpec((tb, 3), lambda i: (i, 0)),          # streamed coords tile
            pl.BlockSpec((tb, ECG_F), lambda i: (i, 0)),      # streamed ecg tile
            pl.BlockSpec((W_ROWS, 128), lambda i: (0, 0)),    # resident weight slab
            pl.BlockSpec((B_ROWS, 128), lambda i: (0, 0)),    # resident bias slab
        ],
        out_specs=pl.BlockSpec((2, tb), lambda i: (0, i)),    # transposed lane-dense out
        compiler_params=pltpu.CompilerParams(
            dimension_semantics=("parallel",)),
    )(coords, ecg_flat, w_slab, b_slab)

    T = out[0, :B].reshape(B, 1)   # softplus(out[:, :1])
    c = out[1, :B].reshape(B, 1)   # softplus(out[:, 1:2])
    return T, c


# ----------------------------- params -----------------------------
def init_params(key):
    """Deterministic synthetic weights for the wrapped PINNWithECG model."""
    ks = jax.random.split(key, 12)

    def lin(kw, kb, fan_in, fan_out):
        w = jax.random.normal(kw, (fan_in, fan_out), jnp.float32) * 0.1
        b = jax.random.normal(kb, (1, fan_out), jnp.float32) * 0.1
        return w, b

    w1p, b1p = lin(ks[0], ks[1], 3, HID)
    w2p, b2p = lin(ks[2], ks[3], HID, LAT)
    w1e, b1e = lin(ks[4], ks[5], ECG_F, HID)
    w2e, b2e = lin(ks[6], ks[7], HID, LAT)
    w1d, b1d = lin(ks[8], ks[9], LAT, HID)
    w2d, b2d = lin(ks[10], ks[11], HID, 2)
    return (w1p, b1p, w2p, b2p, w1e, b1e, w2e, b2e, w1d, b1d, w2d, b2d)


def pack_params(params):
    """Pack the 12 weight/bias tensors into two 128-lane resident VMEM slabs."""
    (w1p, b1p, w2p, b2p, w1e, b1e, w2e, b2e, w1d, b1d, w2d, b2d) = params

    w = jnp.zeros((W_ROWS, 128), jnp.float32)
    # W1 split: coords rows -> hidden cols 0:32; ecg rows -> hidden cols 32:64
    w = w.at[_W1C_ROW:_W1C_ROW + 3, 0:HID].set(w1p)
    w = w.at[_W1E_ROW:_W1E_ROW + ECG_F, HID:HF].set(w1e)
    # block-diagonal W2: pde hidden rows 0:32 -> z cols 0:32; ecg hidden rows 32:64 -> cols 32:64
    w = w.at[_W2_ROW:_W2_ROW + HID, 0:LAT].set(w2p)
    w = w.at[_W2_ROW + HID:_W2_ROW + HF, LAT:ZF].set(w2e)
    # decoder
    w = w.at[_W1D_ROW:_W1D_ROW + LAT, 0:HID].set(w1d)
    w = w.at[_W2D_ROW:_W2D_ROW + HID, 0:2].set(w2d)          # zero-padded to 8 lanes

    b = jnp.zeros((B_ROWS, 128), jnp.float32)
    b = b.at[0, 0:HID].set(b1p[0])
    b = b.at[0, HID:HF].set(b1e[0])
    b = b.at[1, 0:LAT].set(b2p[0])
    b = b.at[1, LAT:ZF].set(b2e[0])
    b = b.at[2, 0:HID].set(b1d[0])
    b = b.at[3, 0:2].set(b2d[0])
    return w, b


# ----------------------------- reference -----------------------------
def reference_forward(x, y, z, ecg, params):
    """Pure-JAX reference of the same forward pass."""
    (w1p, b1p, w2p, b2p, w1e, b1e, w2e, b2e, w1d, b1d, w2d, b2d) = params
    coords = jnp.concatenate([x, y, z], axis=-1)
    e = ecg.reshape(ecg.shape[0], -1)
    z_pde = jnp.tanh(coords @ w1p + b1p) @ w2p + b2p
    z_ecg = jnp.tanh(e @ w1e + b1e) @ w2e + b2e
    out = jnp.tanh((z_pde * z_ecg) @ w1d + b1d) @ w2d + b2d
    sp = jnp.logaddexp(0.0, out)
    return sp[:, 0:1], sp[:, 1:2]


# ----------------------------- main -----------------------------
if __name__ == "__main__":
    key = jax.random.PRNGKey(0)
    k_par, kx, ky, kz, ke, kx2, ky2, kz2, ke2 = jax.random.split(key, 9)

    params = init_params(k_par)
    w_slab, b_slab = pack_params(params)

    # --- small demo batch ---
    B = 8
    x = jax.random.normal(kx, (B, 1), jnp.float32)
    y = jax.random.normal(ky, (B, 1), jnp.float32)
    z = jax.random.normal(kz, (B, 1), jnp.float32)
    ecg = jax.random.normal(ke, (B, LEADS, SEQ), jnp.float32)

    T, c = cached_pinn_forward(x, y, z, ecg, w_slab, b_slab, sim_ids=None)
    T = jax.block_until_ready(T)
    c = jax.block_until_ready(c)
    T_ref, c_ref = reference_forward(x, y, z, ecg, params)
    assert T.shape == (B, 1) and c.shape == (B, 1)
    assert jnp.allclose(T, T_ref, atol=1e-4, rtol=1e-4)
    assert jnp.allclose(c, c_ref, atol=1e-4, rtol=1e-4)

    # --- multi-tile batch: exercises grid tiling + batch padding path ---
    B2 = 300
    x2 = jax.random.normal(kx2, (B2, 1), jnp.float32)
    y2 = jax.random.normal(ky2, (B2, 1), jnp.float32)
    z2 = jax.random.normal(kz2, (B2, 1), jnp.float32)
    ecg2 = jax.random.normal(ke2, (B2, LEADS, SEQ), jnp.float32)

    T2, c2 = cached_pinn_forward(x2, y2, z2, ecg2, w_slab, b_slab,
                                 sim_ids=None, block_b=128)
    T2 = jax.block_until_ready(T2)
    c2 = jax.block_until_ready(c2)
    T2_ref, c2_ref = reference_forward(x2, y2, z2, ecg2, params)
    assert T2.shape == (B2, 1) and c2.shape == (B2, 1)
    assert jnp.allclose(T2, T2_ref, atol=1e-4, rtol=1e-4)
    assert jnp.allclose(c2, c2_ref, atol=1e-4, rtol=1e-4)

    # --- default (large) block size path, >=2 grid steps for v7x megacore ---
    T3, c3 = cached_pinn_forward(x2, y2, z2, ecg2, w_slab, b_slab, sim_ids=None)
    T3 = jax.block_until_ready(T3)
    c3 = jax.block_until_ready(c3)
    assert jnp.allclose(T3, T2_ref, atol=1e-4, rtol=1e-4)
    assert jnp.allclose(c3, c2_ref, atol=1e-4, rtol=1e-4)

    print("KERNEL_OK")
</pallas_src>

<mosaic_0001>
module attributes {stable_mosaic.version = 11 : i64} {
  func.func @pinn_fused_kernel(%arg0: i32, %arg1: memref<128x3xf32, #tpu.memory_space<vmem>>, %arg2: memref<128x32xf32, #tpu.memory_space<vmem>>, %arg3: memref<168x128xf32, #tpu.memory_space<vmem>>, %arg4: memref<8x128xf32, #tpu.memory_space<vmem>>, %arg5: memref<2x128xf32, #tpu.memory_space<vmem>>) attributes {dimension_semantics = [#tpu.dimension_semantics<parallel>], iteration_bounds = array<i64: 1>, scalar_prefetch = 0 : i64, scratch_operands = 0 : i64, tpu.core_type = #tpu.core_type<tc>, window_params = [{transform_indices = @transform_0, window_bounds = array<i64: 128, 3>}, {transform_indices = @transform_1, window_bounds = array<i64: 128, 32>}, {pipeline_mode = #tpu.pipeline_mode<synchronous>, transform_indices = @transform_2, window_bounds = array<i64: 168, 128>}, {pipeline_mode = #tpu.pipeline_mode<synchronous>, transform_indices = @transform_3, window_bounds = array<i64: 8, 128>}, {transform_indices = @transform_4, window_bounds = array<i64: 2, 128>}]} {
    %c0 = arith.constant 0 : index
    %c0_0 = arith.constant 0 : index
    %0 = vector.load %arg1[%c0, %c0_0] : memref<128x3xf32, #tpu.memory_space<vmem>>, vector<128x3xf32>
    %c0_1 = arith.constant 0 : index
    %c0_2 = arith.constant 0 : index
    %1 = vector.load %arg2[%c0_1, %c0_2] : memref<128x32xf32, #tpu.memory_space<vmem>>, vector<128x32xf32>
    %c0_3 = arith.constant 0 : index
    %c0_4 = arith.constant 0 : index
    %2 = vector.load %arg3[%c0_3, %c0_4] : memref<168x128xf32, #tpu.memory_space<vmem>>, vector<3x64xf32>
    %c8 = arith.constant 8 : index
    %c0_5 = arith.constant 0 : index
    %3 = vector.load %arg3[%c8, %c0_5] : memref<168x128xf32, #tpu.memory_space<vmem>>, vector<32x64xf32>
    %c40 = arith.constant 40 : index
    %c0_6 = arith.constant 0 : index
    %4 = vector.load %arg3[%c40, %c0_6] : memref<168x128xf32, #tpu.memory_space<vmem>>, vector<64x64xf32>
    %c104 = arith.constant 104 : index
    %c0_7 = arith.constant 0 : index
    %5 = vector.load %arg3[%c104, %c0_7] : memref<168x128xf32, #tpu.memory_space<vmem>>, vector<32x32xf32>
    %c136 = arith.constant 136 : index
    %c0_8 = arith.constant 0 : index
    %6 = vector.load %arg3[%c136, %c0_8] : memref<168x128xf32, #tpu.memory_space<vmem>>, vector<32x8xf32>
    %c0_9 = arith.constant 0 : index
    %c0_10 = arith.constant 0 : index
    %7 = vector.load %arg4[%c0_9, %c0_10] : memref<8x128xf32, #tpu.memory_space<vmem>>, vector<1x64xf32>
    %c1 = arith.constant 1 : index
    %c0_11 = arith.constant 0 : index
    %8 = vector.load %arg4[%c1, %c0_11] : memref<8x128xf32, #tpu.memory_space<vmem>>, vector<1x64xf32>
    %c2 = arith.constant 2 : index
    %c0_12 = arith.constant 0 : index
    %9 = vector.load %arg4[%c2, %c0_12] : memref<8x128xf32, #tpu.memory_space<vmem>>, vector<1x32xf32>
    %c3 = arith.constant 3 : index
    %c0_13 = arith.constant 0 : index
    %10 = vector.load %arg4[%c3, %c0_13] : memref<8x128xf32, #tpu.memory_space<vmem>>, vector<1x8xf32>
    %cst = arith.constant dense<0.000000e+00> : vector<128x64xf32>
    %11 = tpu.matmul %0, %2, %cst {dimension_numbers = #tpu.dot_dimension_numbers<[1], [0], [0], [1], [0, 0, 1, 1], [], []>} : vector<128x3xf32>, vector<3x64xf32>, vector<128x64xf32> -> vector<128x64xf32>
    %cst_14 = arith.constant dense<0.000000e+00> : vector<128x64xf32>
    %12 = tpu.matmul %1, %3, %cst_14 {dimension_numbers = #tpu.dot_dimension_numbers<[1], [0], [0], [1], [0, 0, 1, 1], [], []>} : vector<128x32xf32>, vector<32x64xf32>, vector<128x64xf32> -> vector<128x64xf32>
    %13 = arith.addf %11, %12 : vector<128x64xf32>
    %14 = vector.broadcast %7 : vector<1x64xf32> to vector<128x64xf32>
    %15 = arith.addf %13, %14 : vector<128x64xf32>
    %16 = math.tanh %15 : vector<128x64xf32>
    %cst_15 = arith.constant dense<0.000000e+00> : vector<128x64xf32>
    %17 = tpu.matmul %16, %4, %cst_15 {dimension_numbers = #tpu.dot_dimension_numbers<[1], [0], [0], [1], [0, 0, 1, 1], [], []>} : vector<128x64xf32>, vector<64x64xf32>, vector<128x64xf32> -> vector<128x64xf32>
    %18 = vector.broadcast %8 : vector<1x64xf32> to vector<128x64xf32>
    %19 = arith.addf %17, %18 : vector<128x64xf32>
    %20 = vector.extract_strided_slice %19 {offsets = [0, 0], sizes = [128, 32], strides = [1, 1]} : vector<128x64xf32> to vector<128x32xf32>
    %21 = vector.extract_strided_slice %19 {offsets = [0, 32], sizes = [128, 32], strides = [1, 1]} : vector<128x64xf32> to vector<128x32xf32>
    %22 = arith.mulf %20, %21 : vector<128x32xf32>
    %cst_16 = arith.constant dense<0.000000e+00> : vector<128x32xf32>
    %23 = tpu.matmul %22, %5, %cst_16 {dimension_numbers = #tpu.dot_dimension_numbers<[1], [0], [0], [1], [0, 0, 1, 1], [], []>} : vector<128x32xf32>, vector<32x32xf32>, vector<128x32xf32> -> vector<128x32xf32>
    %24 = vector.broadcast %9 : vector<1x32xf32> to vector<128x32xf32>
    %25 = arith.addf %23, %24 : vector<128x32xf32>
    %26 = math.tanh %25 : vector<128x32xf32>
    %cst_17 = arith.constant dense<0.000000e+00> : vector<128x8xf32>
    %27 = tpu.matmul %26, %6, %cst_17 {dimension_numbers = #tpu.dot_dimension_numbers<[1], [0], [0], [1], [0, 0, 1, 1], [], []>} : vector<128x32xf32>, vector<32x8xf32>, vector<128x8xf32> -> vector<128x8xf32>
    %28 = vector.broadcast %10 : vector<1x8xf32> to vector<128x8xf32>
    %29 = arith.addf %27, %28 : vector<128x8xf32>
    %30 = tpu.transpose %29, [1, 0] : vector<128x8xf32> -> vector<8x128xf32>
    %31 = vector.extract_strided_slice %30 {offsets = [0, 0], sizes = [2, 128], strides = [1, 1]} : vector<8x128xf32> to vector<2x128xf32>
    %cst_18 = arith.constant 0.000000e+00 : f32
    %32 = vector.broadcast %cst_18 : f32 to vector<2x128xf32>
    %33 = arith.maximumf %32, %31 : vector<2x128xf32>
    %34 = arith.subf %32, %31 : vector<2x128xf32>
    %35 = arith.cmpf one, %34, %34 : vector<2x128xf32>
    %36 = arith.addf %32, %31 : vector<2x128xf32>
    %37 = math.absf %34 : vector<2x128xf32>
    %cst_19 = arith.constant 0.000000e+00 : f32
    %38 = vector.broadcast %cst_19 : f32 to vector<2x128xf32>
    %39 = arith.subf %38, %37 : vector<2x128xf32>
    %40 = math.exp %39 : vector<2x128xf32>
    %41 = math.log1p %40 : vector<2x128xf32>
    %42 = arith.addf %33, %41 : vector<2x128xf32>
    %43 = arith.select %35, %36, %42 : vector<2x128xi1>, vector<2x128xf32>
    %c0_20 = arith.constant 0 : index
    %c0_21 = arith.constant 0 : index
    %44 = vector.load %arg5[%c0_20, %c0_21] : memref<2x128xf32, #tpu.memory_space<vmem>>, vector<2x128xf32>
    tpu.vector_store %arg5[%c0_20, %c0_21], %43 {strides = array<i32>} : memref<2x128xf32, #tpu.memory_space<vmem>>, vector<2x128xf32>,
    return
  }
  func.func @transform_0(%arg0: i32) -> (i32, i32) {
    %c0_i32 = arith.constant 0 : i32
    %c0_i32_0 = arith.constant 0 : i32
    return %arg0, %c0_i32 : i32, i32
  }
  func.func @transform_1(%arg0: i32) -> (i32, i32) {
    %c0_i32 = arith.constant 0 : i32
    %c0_i32_0 = arith.constant 0 : i32
    return %arg0, %c0_i32 : i32, i32
  }
  func.func @transform_2(%arg0: i32) -> (i32, i32) {
    %c0_i32 = arith.constant 0 : i32
    %c0_i32_0 = arith.constant 0 : i32
    %c0_i32_1 = arith.constant 0 : i32
    return %c0_i32, %c0_i32_0 : i32, i32
  }
  func.func @transform_3(%arg0: i32) -> (i32, i32) {
    %c0_i32 = arith.constant 0 : i32
    %c0_i32_0 = arith.constant 0 : i32
    %c0_i32_1 = arith.constant 0 : i32
    return %c0_i32, %c0_i32_0 : i32, i32
  }
  func.func @transform_4(%arg0: i32) -> (i32, i32) {
    %c0_i32 = arith.constant 0 : i32
    %c0_i32_0 = arith.constant 0 : i32
    return %c0_i32, %arg0 : i32, i32
  }
}

</mosaic_0001>

<bundles_post_ra>
// kernel: cached_pinn_forward.1
= control target key start
LH: loop header
LB: loop body
LE: loop exit
PB: predicated region body
PF: predicated region fallthrough
CT: control target
= control target key end

     0   :  { %vm74_vm0 = vcmask 261120   ;;  %vm317_vm1 = vcmask 1042432   ;;  %vm268_vm2 = vcmask 23552   ;;  %vm506_vm3 = vcmask 523264   ;;  %s1665_s10 = smov 96   ;;  %s1986_s2 = inlined_call_operand.vmem [shape: f32[168,128], index: 2, kind: input, shape index: {}]   ;;  %s1987_s1 = inlined_call_operand.vmem [shape: f32[128,32], index: 1, kind: input, shape index: {}]   ;;  %s1988_s0 = inlined_call_operand.vmem [shape: f32[128,3], index: 0, kind: input, shape index: {}]   ;;  %s1989_s3 = inlined_call_operand.vmem [shape: f32[8,128], index: 3, kind: input, shape index: {}]   ;;  %s1990_s4 = inlined_call_operand.vmem [shape: f32[2,128], index: 4, kind: output, shape index: {}]  }
   0x1   :  { %v53_v0 = vld [vmem:[%s1986_s2 + $0x20] sm:$0xff]  ;;  %v52_v1 = vld [vmem:[%s1986_s2 + $0x18] sm:$0xff]  ;;  %v51_v3 = vld [vmem:[%s1986_s2 + $0x10] sm:$0xff] }
   0x2   :  { %1432 = vmatprep.subr.mxu0 %v53_v0  ;;  %v33_v2 = vld [vmem:[%s1987_s1] sm:$0xff]  ;;  %v50_v5 = vld [vmem:[%s1986_s2 + $0x8] sm:$0xff]  ;;  %v23_v6 = vld [vmem:[%s1988_s0 + $0x30] sm:$0xff] }
   0x3   :  { %1433 = vmatpush3.msra.mxu0 %v53_v0  ;;  %1440 = vmatprep.mubr.msk.f32.mxu0 %vm74_vm0, %v33_v2  ;;  %v49_v4 = vld [vmem:[%s1986_s2] sm:$0x7]  ;;  %v24_v7 = vld [vmem:[%s1988_s0 + $0x38] sm:$0xff]  ;;  %v34_v9 = vld [vmem:[%s1987_s1 + $0x8] sm:$0xff] }
   0x4   :  { %1434 = vmatprep.subr.mxu0 %v52_v1  ;;  %1594 = vmatprep.subr.msk.mxu1 %vm317_vm1, %v49_v4  ;;  %v25_v8 = vld [vmem:[%s1988_s0 + $0x40] sm:$0xff]  ;;  %v35_v10 = vld [vmem:[%s1987_s1 + $0x10] sm:$0xff]  ;;  %v26_v11 = vld [vmem:[%s1988_s0 + $0x48] sm:$0xff] }
   0x5   :  { %1435 = vmatpush3.msra.mxu0 %v52_v1  ;;  %1595 = vmatpush3.msk.msra.mxu1 %vm317_vm1, %v49_v4  ;;  %v27_v12 = vld [vmem:[%s1988_s0 + $0x50] sm:$0xff]  ;;  %v36_v13 = vld [vmem:[%s1987_s1 + $0x18] sm:$0xff]  ;;  %v37_v14 = vld [vmem:[%s1987_s1 + $0x20] sm:$0xff] }
   0x6   :  { %1436 = vmatprep.subr.mxu0 %v51_v3  ;;  %1475 = vmatprep.mubr.msk.f32.mxu1 %vm268_vm2, %v23_v6  ;;  %v28_v15 = vld [vmem:[%s1988_s0 + $0x58] sm:$0xff]  ;;  %v29_v16 = vld [vmem:[%s1988_s0 + $0x60] sm:$0xff]  ;;  %v38_v17 = vld [vmem:[%s1987_s1 + $0x28] sm:$0xff] }
   0x7   :  { %1437 = vmatpush3.msra.mxu0 %v51_v3  ;;  %1476 = vmatmul.mubr.msk.f32.vlgmr.msra.gmra.mxu1 %vm268_vm2, %v24_v7  ;;  %v39_v18 = vld [vmem:[%s1987_s1 + $0x30] sm:$0xff]  ;;  %v30_v19 = vld [vmem:[%s1988_s0 + $0x68] sm:$0xff]  ;;  %v40_v21 = vld [vmem:[%s1987_s1 + $0x38] sm:$0xff] }
   0x8   :  { %1438 = vmatprep.subr.mxu0 %v50_v5  ;;  %1478 = vmatprep.mubr.msk.f32.mxu1 %vm268_vm2, %v25_v8  ;;  %v31_v20 = vld [vmem:[%s1988_s0 + $0x70] sm:$0xff]  ;;  %v41_v22 = vld [vmem:[%s1987_s1 + $0x40] sm:$0xff]  ;;  %v32_v23 = vld [vmem:[%s1988_s0 + $0x78] sm:$0xff] }
   0x9   :  { %1439 = vmatpush3.msra.mxu0 %v50_v5  ;;  %v42_v24 = vld [vmem:[%s1987_s1 + $0x48] sm:$0xff]  ;;  %v43_v25 = vld [vmem:[%s1987_s1 + $0x50] sm:$0xff]  ;;  %v44_v26 = vld [vmem:[%s1987_s1 + $0x58] sm:$0xff] }
   0xa   :  { %1441 = vmatmul.mubr.msk.f32.vlgmr.msra.gmra.mxu0 %vm74_vm0, %v34_v9  ;;  %1464 = vmatprep.subr.msk.mxu0 %vm317_vm1, %v49_v4  ;;  %v45_v27 = vld [vmem:[%s1987_s1 + $0x60] sm:$0xff]  ;;  %v46_v28 = vld [vmem:[%s1987_s1 + $0x68] sm:$0xff]  ;;  %v47_v29 = vld [vmem:[%s1987_s1 + $0x70] sm:$0xff] }
   0xb   :  { %1465 = vmatpush3.msk.msra.mxu0 %vm317_vm1, %v49_v4  ;;  %1443 = vmatprep.mubr.msk.f32.mxu0 %vm74_vm0, %v35_v10  ;;  %v48_v30 = vld [vmem:[%s1987_s1 + $0x78] sm:$0xff]  ;;  %v17_v31 = vld [vmem:[%s1988_s0] sm:$0xff]  ;;  %v18_v32 = vld [vmem:[%s1988_s0 + $0x8] sm:$0xff] }
   0xc   :  { %1479 = vmatmul.mubr.msk.f32.gmra.mxu1 %vm268_vm2, %v26_v11  ;;  %v19_v33 = vld [vmem:[%s1988_s0 + $0x10] sm:$0xff]  ;;  %v20_v34 = vld [vmem:[%s1988_s0 + $0x18] sm:$0xff]  ;;  %v21_v35 = vld [vmem:[%s1988_s0 + $0x20] sm:$0xff] }
   0xd   :  { %1481 = vmatprep.mubr.msk.f32.mxu1 %vm268_vm2, %v27_v12  ;;  %v22_v36 = vld [vmem:[%s1988_s0 + $0x28] sm:$0xff]  ;;  %v61_v37 = vld [vmem:[%s1986_s2 + $0x60] sm:$0xff]  ;;  %v60_v38 = vld [vmem:[%s1986_s2 + $0x58] sm:$0xff] }
   0xe   :  { %1444 = vmatmul.mubr.msk.f32.gmra.mxu0 %vm74_vm0, %v36_v13  ;;  %1490 = vmatprep.subr.mxu1 %v61_v37  ;;  %v59_v39 = vld [vmem:[%s1986_s2 + $0x50] sm:$0xff]  ;;  %v58_v40 = vld [vmem:[%s1986_s2 + $0x48] sm:$0xff]  ;;  %v57_v41 = vld [vmem:[%s1986_s2 + $0x40] sm:$0xff] }
   0xf   :  { %1446 = vmatprep.mubr.msk.f32.mxu0 %vm74_vm0, %v37_v14  ;;  %1491 = vmatpush3.msra.mxu1 %v61_v37  ;;  %v56_v42 = vld [vmem:[%s1986_s2 + $0x38] sm:$0xff]  ;;  %v55_v43 = vld [vmem:[%s1986_s2 + $0x30] sm:$0xff]  ;;  %v54_v44 = vld [vmem:[%s1986_s2 + $0x28] sm:$0xff] }
  0x10   :  { %1482 = vmatmul.mubr.msk.f32.gmra.mxu1 %vm268_vm2, %v28_v15  ;;  %1492 = vmatprep.subr.mxu1 %v60_v38  ;;  %v1867_v5 = vld [vmem:[%s1989_s3] ss:$0 sm:$0xff] }
  0x11   :  { %1484 = vmatprep.mubr.msk.f32.mxu1 %vm268_vm2, %v29_v16  ;;  %1493 = vmatpush3.msra.mxu1 %v60_v38 }
  0x12   :  { %1447 = vmatmul.mubr.msk.f32.gmra.mxu0 %vm74_vm0, %v38_v17  ;;  %1494 = vmatprep.subr.mxu1 %v59_v39 }
  0x13   :  { %1449 = vmatprep.mubr.msk.f32.mxu0 %vm74_vm0, %v39_v18  ;;  %1495 = vmatpush3.msra.mxu1 %v59_v39 }
  0x14   :  { %1485 = vmatmul.mubr.msk.f32.gmra.mxu1 %vm268_vm2, %v30_v19  ;;  %1496 = vmatprep.subr.mxu1 %v58_v40 }
  0x15   :  { %1487 = vmatprep.mubr.msk.f32.mxu1 %vm268_vm2, %v31_v20  ;;  %1497 = vmatpush3.msra.mxu1 %v58_v40 }
  0x16   :  { %1450 = vmatmul.mubr.msk.f32.gmra.mxu0 %vm74_vm0, %v40_v21  ;;  %1498 = vmatprep.subr.mxu1 %v57_v41 }
  0x17   :  { %1452 = vmatprep.mubr.msk.f32.mxu0 %vm74_vm0, %v41_v22  ;;  %1499 = vmatpush3.msra.mxu1 %v57_v41 }
  0x18   :  { %1488 = vmatmul.mubr.msk.f32.gmra.mxu1 %vm268_vm2, %v32_v23  ;;  %1500 = vmatprep.subr.mxu1 %v56_v42 }
  0x19   :  { %1501 = vmatpush3.msra.mxu1 %v56_v42 }
  0x1a   :  { %1453 = vmatmul.mubr.msk.f32.gmra.mxu0 %vm74_vm0, %v42_v24  ;;  %1502 = vmatprep.subr.mxu1 %v55_v43 }
  0x1b   :  { %1455 = vmatprep.mubr.msk.f32.mxu0 %vm74_vm0, %v43_v25  ;;  %1503 = vmatpush3.msra.mxu1 %v55_v43 }
  0x1c   :  { %1504 = vmatprep.subr.mxu1 %v54_v44 }
  0x1d   :  { %1505 = vmatpush3.msra.mxu1 %v54_v44 }
  0x1e   :  { %1456 = vmatmul.mubr.msk.f32.gmra.mxu0 %vm74_vm0, %v44_v26 }
  0x1f   :  { %1458 = vmatprep.mubr.msk.f32.mxu0 %vm74_vm0, %v45_v27 }
  0x22   :  { %1459 = vmatmul.mubr.msk.f32.gmra.mxu0 %vm74_vm0, %v46_v28 }
  0x23   :  { %1461 = vmatprep.mubr.msk.f32.mxu0 %vm74_vm0, %v47_v29 }
  0x26   :  { %1462 = vmatmul.mubr.msk.f32.gmra.mxu0 %vm74_vm0, %v48_v30 }
  0x27   :  { %1466 = vmatprep.mubr.msk.f32.mxu0 %vm268_vm2, %v17_v31 }
  0x2a   :  { %1467 = vmatmul.mubr.msk.f32.vlgmr.msra.gmra.mxu0 %vm268_vm2, %v18_v32 }
  0x2b   :  { %1469 = vmatprep.mubr.msk.f32.mxu0 %vm268_vm2, %v19_v33 }
  0x2e   :  { %1470 = vmatmul.mubr.msk.f32.gmra.mxu0 %vm268_vm2, %v20_v34 }
  0x2f   :  { %1472 = vmatprep.mubr.msk.f32.mxu0 %vm268_vm2, %v21_v35 }
  0x32   :  { %1473 = vmatmul.mubr.msk.f32.gmra.mxu0 %vm268_vm2, %v22_v36 }
  0xc7   :  { %v1477_v54 = vpop.f32.mrf.mxu1 }
  0xc9   :  { %v417_v57 = vpop.f32.mrf.mxu1 }
  0xca   :  { %v1442_v45 = vpop.f32.mrf.mxu0 }
  0xcc   :  { %v189_v46 = vpop.f32.mrf.mxu0  ;;  %v1480_v60 = vpop.f32.mrf.mxu1 }
  0xce   :  { %v1445_v47 = vpop.f32.mrf.mxu0  ;;  %v427_v63 = vpop.f32.mrf.mxu1 }
  0xd0   :  { %v199_v48 = vpop.f32.mrf.mxu0  ;;  %v1483_v3 = vpop.f32.mrf.mxu1 }
  0xd2   :  { %v1448_v49 = vpop.f32.mrf.mxu0  ;;  %v437_v11 = vpop.f32.mrf.mxu1 }
  0xd4   :  { %v209_v50 = vpop.f32.mrf.mxu0  ;;  %v1486_v19 = vpop.f32.mrf.mxu1 }
  0xd6   :  { %v1451_v51 = vpop.f32.mrf.mxu0  ;;  %v447_v27 = vpop.f32.mrf.mxu1 }
  0xd7   :  { %v423_v22 = vadd.f32 %v1477_v54, %v1451_v51 }
  0xd8   :  { %v219_v52 = vpop.f32.mrf.mxu0  ;;  %v1489_v32 = vpop.f32.mrf.mxu1 }
  0xd9   :  { %v418_v16 = vadd.f32 %v417_v57, %v219_v52  ;;  %v477_v28 = vadd.f32 %v1867_v5, %v423_v22 }
  0xda   :  { %v1454_v53 = vpop.f32.mrf.mxu0  ;;  %v457_v39 = vpop.f32.mrf.mxu1 }
  0xdb   :  { %v476_v24 = vadd.f32 %v1867_v5, %v418_v16  ;;  %v433_v29 = vadd.f32 %v1480_v60, %v1454_v53 }
  0xdc   :  { %v229_v55 = vpop.f32.mrf.mxu0 }
  0xdd   :  { %v428_v25 = vadd.f32 %v427_v63, %v229_v55  ;;  %v479_v34 = vadd.f32 %v1867_v5, %v433_v29  ;;  %v64_v63 = vld [vmem:[%s1986_s2 + $0x78] sm:$0xff] }
  0xde   :  { %v1457_v56 = vpop.f32.mrf.mxu0 }
  0xdf   :  { %v478_v30 = vadd.f32 %v1867_v5, %v428_v25  ;;  %v443_v35 = vadd.f32 %v1483_v3, %v1457_v56  ;;  %v1280_v3 = vld [vmem:[%s1989_s3 + $0x1] ss:$0 sm:$0xff] }
  0xe0   :  { %v239_v58 = vpop.f32.mrf.mxu0 }
  0xe1   :  { %v438_v31 = vadd.f32 %v437_v11, %v239_v58  ;;  %v481_v41 = vadd.f32 %v1867_v5, %v443_v35 }
  0xe2   :  { %v1460_v59 = vpop.f32.mrf.mxu0 }
  0xe3   :  { %v480_v37 = vadd.f32 %v1867_v5, %v438_v31  ;;  %v453_v42 = vadd.f32 %v1486_v19, %v1460_v59  ;;  %v68_v31 = vld [vmem:[%s1986_s2 + $0x98] sm:$0xff] }
  0xe4   :  { %v249_v61 = vpop.f32.mrf.mxu0 }
  0xe5   :  { %v448_v38 = vadd.f32 %v447_v27, %v249_v61 }
  0xe6   :  { %v1862_v62 = vpop.f32.mrf.mxu0 }
  0xe7   :  { %v482_v44 = vadd.f32 %v1867_v5, %v448_v38 }
  0xe8   :  { %v259_v0 = vpop.f32.mrf.mxu0 }
  0xea   :  { %v1468_v1 = vpop.f32.mrf.mxu0 }
  0xeb   :  { %v393_v2 = vadd.f32 %v1468_v1, %v1442_v45  ;;  %v458_v45 = vadd.f32 %v457_v39, %v259_v0  ;;  %v63_v0 = vld [vmem:[%s1986_s2 + $0x70] sm:$0xff]  ;;  %v62_v1 = vld [vmem:[%s1986_s2 + $0x68] sm:$0xff] }
  0xec   :  { %v387_v4 = vpop.f32.mrf.mxu0 }
  0xed   :  { %v388_v6 = vadd.f32 %v387_v4, %v189_v46  ;;  %v471_v7 = vadd.f32 %v1867_v5, %v393_v2 }
  0xee   :  { %v1471_v8 = vpop.f32.mrf.mxu0 }
  0xef   :  { %v470_v9 = vadd.f32 %v1867_v5, %v388_v6  ;;  %v403_v10 = vadd.f32 %v1471_v8, %v1445_v47  ;;  %v483_v47 = vadd.f32 %v1867_v5, %v453_v42 }
  0xf0   :  { %v397_v12 = vpop.f32.mrf.mxu0 }
  0xf1   :  { %1597 = vtanh.f32 %v470_v9  ;;  %v398_v13 = vadd.f32 %v397_v12, %v199_v48  ;;  %v473_v14 = vadd.f32 %v1867_v5, %v403_v10  ;;  %v463_v48 = vadd.f32 %v1489_v32, %v1862_v62  ;;  %v65_v62 = vld [vmem:[%s1986_s2 + $0x80] sm:$0xff] }
  0xf2   :  { %1599 = vtanh.f32 %v471_v7  ;;  %v1474_v15 = vpop.f32.mrf.mxu0  ;;  %1530 = vmatprep.subr.mxu0 %v65_v62 }
  0xf3   :  { %v472_v17 = vadd.f32 %v1867_v5, %v398_v13  ;;  %v413_v18 = vadd.f32 %v1474_v15, %v1448_v49  ;;  %v485_v52 = vadd.f32 %v1867_v5, %v463_v48  ;;  %1531 = vmatpush3.msra.mxu0 %v65_v62 }
  0xf4   :  { %v407_v20 = vpop.f32.mrf.mxu0  ;;  %1532 = vmatprep.subr.mxu0 %v64_v63 }
  0xf5   :  { %1601 = vtanh.f32 %v472_v17  ;;  %v408_v21 = vadd.f32 %v407_v20, %v209_v50  ;;  %v475_v23 = vadd.f32 %v1867_v5, %v413_v18  ;;  %v484_v50 = vadd.f32 %v1867_v5, %v458_v45  ;;  %1533 = vmatpush3.msra.mxu0 %v64_v63 }
  0xf6   :  { %1603 = vtanh.f32 %v473_v14  ;;  %1534 = vmatprep.subr.mxu0 %v63_v0 }
  0xf7   :  { %v474_v26 = vadd.f32 %v1867_v5, %v408_v21  ;;  %1535 = vmatpush3.msra.mxu0 %v63_v0 }
  0xf8   :  { %1536 = vmatprep.subr.mxu0 %v62_v1 }
  0xf9   :  { %1605 = vtanh.f32 %v474_v26  ;;  %1537 = vmatpush3.msra.mxu0 %v62_v1 }
  0xfa   :  { %1607 = vtanh.f32 %v475_v23 }
  0xfb   :  { %1609 = vtanh.f32 %v476_v24 }
  0xfc   :  { %1611 = vtanh.f32 %v477_v28  ;;  %v69_v28 = vld [vmem:[%s1986_s2 + $0xa0] sm:$0xff] }
  0xfd   :  { %1613 = vtanh.f32 %v478_v30  ;;  %1562 = vmatprep.subr.mxu1 %v69_v28 }
  0xfe   :  { %v1598_v33 = vpop.eup %1597  ;;  %1615 = vtanh.f32 %v479_v34 }
  0xff   :  { %v1600_v36 = vpop.eup %1599  ;;  %1506 = vmatprep.mubr.msk.f32.mxu1 %vm506_vm3, %v1598_v33  ;;  %1617 = vtanh.f32 %v480_v37 }
 0x100   :  { %1507 = vmatmul.mubr.msk.f32.vlgmr.msra.gmra.mxu1 %vm506_vm3, %v1600_v36  ;;  %1619 = vtanh.f32 %v481_v41 }
 0x101   :  { %1621 = vtanh.f32 %v482_v44  ;;  %1563 = vmatpush3.msra.mxu1 %v69_v28 }
 0x102   :  { %v1602_v40 = vpop.eup %1601  ;;  %1623 = vtanh.f32 %v483_v47  ;;  %1564 = vmatprep.subr.mxu1 %v68_v31 }
 0x103   :  { %v1604_v43 = vpop.eup %1603  ;;  %1509 = vmatprep.mubr.msk.f32.mxu1 %vm506_vm3, %v1602_v40  ;;  %1625 = vtanh.f32 %v484_v50  ;;  %1565 = vmatpush3.msra.mxu1 %v68_v31 }
 0x104   :  { %1510 = vmatmul.mubr.msk.f32.gmra.mxu1 %vm506_vm3, %v1604_v43  ;;  %1627 = vtanh.f32 %v485_v52 }
 0x106   :  { %v1606_v46 = vpop.eup %1605 }
 0x107   :  { %v1608_v49 = vpop.eup %1607  ;;  %1512 = vmatprep.mubr.msk.f32.mxu1 %vm506_vm3, %v1606_v46 }
 0x108   :  { %v1610_v51 = vpop.eup %1609  ;;  %1513 = vmatmul.mubr.msk.f32.gmra.mxu1 %vm506_vm3, %v1608_v49 }
 0x109   :  { %1515 = vmatprep.mubr.msk.f32.mxu1 %vm506_vm3, %v1610_v51  ;;  %v1612_v53 = vpop.eup %1611 }
 0x10a   :  { %v1614_v54 = vpop.eup %1613 }
 0x10b   :  { %v1616_v55 = vpop.eup %1615 }
 0x10c   :  { %1516 = vmatmul.mubr.msk.f32.gmra.mxu1 %vm506_vm3, %v1612_v53  ;;  %v1618_v56 = vpop.eup %1617 }
 0x10d   :  { %1518 = vmatprep.mubr.msk.f32.mxu1 %vm506_vm3, %v1614_v54  ;;  %v1620_v57 = vpop.eup %1619 }
 0x10e   :  { %v1622_v58 = vpop.eup %1621 }
 0x10f   :  { %v1624_v59 = vpop.eup %1623 }
 0x110   :  { %1519 = vmatmul.mubr.msk.f32.gmra.mxu1 %vm506_vm3, %v1616_v55  ;;  %v1626_v60 = vpop.eup %1625 }
 0x111   :  { %1521 = vmatprep.mubr.msk.f32.mxu1 %vm506_vm3, %v1618_v56  ;;  %v1628_v61 = vpop.eup %1627 }
 0x114   :  { %1522 = vmatmul.mubr.msk.f32.gmra.mxu1 %vm506_vm3, %v1620_v57 }
 0x115   :  { %1524 = vmatprep.mubr.msk.f32.mxu1 %vm506_vm3, %v1622_v58 }
 0x118   :  { %1525 = vmatmul.mubr.msk.f32.gmra.mxu1 %vm506_vm3, %v1624_v59 }
 0x119   :  { %1527 = vmatprep.mubr.msk.f32.mxu1 %vm506_vm3, %v1626_v60 }
 0x11c   :  { %1528 = vmatmul.mubr.msk.f32.gmra.mxu1 %vm506_vm3, %v1628_v61 }
 0x1c0   :  { %v1508_v2 = vpop.f32.mrf.mxu1 }
 0x1c1   :  { %v627_v8 = vadd.f32 %v1508_v2, %v1280_v3 }
 0x1c2   :  { %v621_v4 = vpop.f32.mrf.mxu1 }
 0x1c3   :  { %v622_v5 = vadd.f32 %v1280_v3, %v621_v4 }
 0x1c4   :  { %v1511_v6 = vpop.f32.mrf.mxu1 }
 0x1c5   :  { %716 = vrot.lane.b32.xlu0 %v622_v5, %s1665_s10  ;;  %v637_v12 = vadd.f32 %v1511_v6, %v1280_v3  ;;  %v66_v6 = vld [vmem:[%s1986_s2 + $0x88] sm:$0xff] }
 0x1c6   :  { %v631_v7 = vpop.f32.mrf.mxu1 }
 0x1c7   :  { %v632_v9 = vadd.f32 %v1280_v3, %v631_v7  ;;  %v1297_v7 = vld [vmem:[%s1989_s3 + $0x2] ss:$0 sm:$0xff] }
 0x1c8   :  { %v1514_v10 = vpop.f32.mrf.mxu1 }
 0x1c9   :  { %720 = vrot.lane.b32.xlu1 %v632_v9, %s1665_s10  ;;  %718 = vrot.lane.b32.xlu0 %v627_v8, %s1665_s10  ;;  %v647_v16 = vadd.f32 %v1514_v10, %v1280_v3 }
 0x1ca   :  { %v641_v11 = vpop.f32.mrf.mxu1 }
 0x1cb   :  { %v642_v13 = vadd.f32 %v1280_v3, %v641_v11 }
 0x1cc   :  { %v1517_v14 = vpop.f32.mrf.mxu1 }
 0x1cd   :  { %722 = vrot.lane.b32.xlu1 %v637_v12, %s1665_s10  ;;  %724 = vrot.lane.b32.xlu0 %v642_v13, %s1665_s10  ;;  %v657_v20 = vadd.f32 %v1517_v14, %v1280_v3 }
 0x1ce   :  { %v651_v15 = vpop.f32.mrf.mxu1 }
 0x1cf   :  { %v652_v17 = vadd.f32 %v1280_v3, %v651_v15 }
 0x1d0   :  { %v1520_v18 = vpop.f32.mrf.mxu1 }
 0x1d1   :  { %726 = vrot.lane.b32.xlu1 %v647_v16, %s1665_s10  ;;  %728 = vrot.lane.b32.xlu0 %v652_v17, %s1665_s10  ;;  %v667_v24 = vadd.f32 %v1520_v18, %v1280_v3 }
 0x1d2   :  { %v661_v19 = vpop.f32.mrf.mxu1 }
 0x1d3   :  { %v662_v21 = vadd.f32 %v1280_v3, %v661_v19 }
 0x1d4   :  { %v1523_v22 = vpop.f32.mrf.mxu1 }
 0x1d5   :  { %730 = vrot.lane.b32.xlu1 %v657_v20, %s1665_s10  ;;  %732 = vrot.lane.b32.xlu0 %v662_v21, %s1665_s10  ;;  %v677_v29 = vadd.f32 %v1523_v22, %v1280_v3 }
 0x1d6   :  { %v671_v23 = vpop.f32.mrf.mxu1 }
 0x1d7   :  { %v672_v25 = vadd.f32 %v1280_v3, %v671_v23 }
 0x1d8   :  { %v1526_v26 = vpop.f32.mrf.mxu1 }
 0x1d9   :  { %734 = vrot.lane.b32.xlu1 %v667_v24, %s1665_s10  ;;  %736 = vrot.lane.b32.xlu0 %v672_v25, %s1665_s10  ;;  %v687_v34 = vadd.f32 %v1526_v26, %v1280_v3 }
 0x1da   :  { %v681_v27 = vpop.f32.mrf.mxu1 }
 0x1db   :  { %v682_v30 = vadd.f32 %v1280_v3, %v681_v27 }
 0x1dc   :  { %v1529_v32 = vpop.f32.mrf.mxu1 }
 0x1dd   :  { %738 = vrot.lane.b32.xlu1 %v677_v29, %s1665_s10  ;;  %740 = vrot.lane.b32.xlu0 %v682_v30, %s1665_s10  ;;  %v697_v36 = vadd.f32 %v1529_v32, %v1280_v3 }
 0x1de   :  { %v691_v33 = vpop.f32.mrf.mxu1 }
 0x1df   :  { %v692_v35 = vadd.f32 %v1280_v3, %v691_v33 }
 0x1e1   :  { %742 = vrot.lane.b32.xlu1 %v687_v34, %s1665_s10  ;;  %744 = vrot.lane.b32.xlu0 %v692_v35, %s1665_s10 }
 0x1e5   :  { %746 = vrot.lane.b32.xlu1 %v697_v36, %s1665_s10 }
 0x237   :  { %v717_v37 = vpop.permute.xlu0 %716 }
 0x238   :  { %v764_v38 = vmul.f32 %v717_v37, %v622_v5  ;;  %v67_v5 = vld [vmem:[%s1986_s2 + $0x90] sm:$0xff] }
 0x239   :  { %1566 = vmatprep.subr.mxu1 %v67_v5 }
 0x23a   :  { %1538 = vmatprep.mubr.msk.f32.mxu0 %vm74_vm0, %v764_v38  ;;  %1567 = vmatpush3.msra.mxu1 %v67_v5 }
 0x23b   :  { %v721_v39 = vpop.permute.xlu1 %720  ;;  %v719_v40 = vpop.permute.xlu0 %718  ;;  %1568 = vmatprep.subr.mxu1 %v66_v6 }
 0x23c   :  { %v766_v41 = vmul.f32 %v721_v39, %v632_v9  ;;  %v765_v42 = vmul.f32 %v719_v40, %v627_v8  ;;  %1569 = vmatpush3.msra.mxu1 %v66_v6 }
 0x23e   :  { %1539 = vmatmul.mubr.msk.f32.vlgmr.msra.gmra.mxu0 %vm74_vm0, %v765_v42 }
 0x23f   :  { %v723_v43 = vpop.permute.xlu1 %722  ;;  %1541 = vmatprep.mubr.msk.f32.mxu0 %vm74_vm0, %v766_v41  ;;  %v725_v44 = vpop.permute.xlu0 %724 }
 0x240   :  { %v767_v45 = vmul.f32 %v723_v43, %v637_v12  ;;  %v768_v46 = vmul.f32 %v725_v44, %v642_v13 }
 0x242   :  { %1542 = vmatmul.mubr.msk.f32.gmra.mxu0 %vm74_vm0, %v767_v45 }
 0x243   :  { %v727_v47 = vpop.permute.xlu1 %726  ;;  %1544 = vmatprep.mubr.msk.f32.mxu0 %vm74_vm0, %v768_v46  ;;  %v729_v48 = vpop.permute.xlu0 %728 }
 0x244   :  { %v769_v49 = vmul.f32 %v727_v47, %v647_v16  ;;  %v770_v50 = vmul.f32 %v729_v48, %v652_v17 }
 0x246   :  { %1545 = vmatmul.mubr.msk.f32.gmra.mxu0 %vm74_vm0, %v769_v49 }
 0x247   :  { %v731_v51 = vpop.permute.xlu1 %730  ;;  %1547 = vmatprep.mubr.msk.f32.mxu0 %vm74_vm0, %v770_v50  ;;  %v733_v52 = vpop.permute.xlu0 %732 }
 0x248   :  { %v771_v53 = vmul.f32 %v731_v51, %v657_v20  ;;  %v772_v54 = vmul.f32 %v733_v52, %v662_v21 }
 0x24a   :  { %1548 = vmatmul.mubr.msk.f32.gmra.mxu0 %vm74_vm0, %v771_v53 }
 0x24b   :  { %v735_v55 = vpop.permute.xlu1 %734  ;;  %1550 = vmatprep.mubr.msk.f32.mxu0 %vm74_vm0, %v772_v54  ;;  %v737_v56 = vpop.permute.xlu0 %736 }
 0x24c   :  { %v773_v57 = vmul.f32 %v735_v55, %v667_v24  ;;  %v774_v58 = vmul.f32 %v737_v56, %v672_v25 }
 0x24e   :  { %1551 = vmatmul.mubr.msk.f32.gmra.mxu0 %vm74_vm0, %v773_v57  ;;  %v1314_v57 = vld [vmem:[%s1989_s3 + $0x3] ss:$0 sm:$0xff] }
 0x24f   :  { %v739_v59 = vpop.permute.xlu1 %738  ;;  %1553 = vmatprep.mubr.msk.f32.mxu0 %vm74_vm0, %v774_v58  ;;  %v741_v60 = vpop.permute.xlu0 %740 }
 0x250   :  { %v775_v61 = vmul.f32 %v739_v59, %v677_v29  ;;  %v776_v62 = vmul.f32 %v741_v60, %v682_v30 }
 0x252   :  { %1554 = vmatmul.mubr.msk.f32.gmra.mxu0 %vm74_vm0, %v775_v61 }
 0x253   :  { %v743_v63 = vpop.permute.xlu1 %742  ;;  %1556 = vmatprep.mubr.msk.f32.mxu0 %vm74_vm0, %v776_v62  ;;  %v745_v0 = vpop.permute.xlu0 %744 }
 0x254   :  { %v777_v1 = vmul.f32 %v743_v63, %v687_v34  ;;  %v778_v2 = vmul.f32 %v745_v0, %v692_v35 }
 0x256   :  { %1557 = vmatmul.mubr.msk.f32.gmra.mxu0 %vm74_vm0, %v777_v1 }
 0x257   :  { %v747_v3 = vpop.permute.xlu1 %746  ;;  %1559 = vmatprep.mubr.msk.f32.mxu0 %vm74_vm0, %v778_v2 }
 0x258   :  { %v779_v4 = vmul.f32 %v747_v3, %v697_v36 }
 0x25a   :  { %1560 = vmatmul.mubr.msk.f32.gmra.mxu0 %vm74_vm0, %v779_v4 }
 0x2fe   :  { %v1540_v8 = vpop.f32.mrf.mxu0 }
 0x2ff   :  { %v904_v9 = vadd.f32 %v1540_v8, %v1297_v7 }
 0x300   :  { %v898_v10 = vpop.f32.mrf.mxu0 }
 0x301   :  { %v899_v11 = vadd.f32 %v1297_v7, %v898_v10 }
 0x302   :  { %v1543_v12 = vpop.f32.mrf.mxu0 }
 0x303   :  { %1629 = vtanh.f32 %v899_v11  ;;  %v914_v13 = vadd.f32 %v1543_v12, %v1297_v7 }
 0x304   :  { %1631 = vtanh.f32 %v904_v9  ;;  %v908_v14 = vpop.f32.mrf.mxu0 }
 0x305   :  { %v909_v15 = vadd.f32 %v1297_v7, %v908_v14 }
 0x306   :  { %v1546_v16 = vpop.f32.mrf.mxu0 }
 0x307   :  { %1633 = vtanh.f32 %v909_v15  ;;  %v924_v17 = vadd.f32 %v1546_v16, %v1297_v7 }
 0x308   :  { %1635 = vtanh.f32 %v914_v13  ;;  %v918_v18 = vpop.f32.mrf.mxu0 }
 0x309   :  { %v919_v19 = vadd.f32 %v1297_v7, %v918_v18 }
 0x30a   :  { %v1549_v20 = vpop.f32.mrf.mxu0 }
 0x30b   :  { %1637 = vtanh.f32 %v919_v19  ;;  %v934_v21 = vadd.f32 %v1549_v20, %v1297_v7 }
 0x30c   :  { %1639 = vtanh.f32 %v924_v17  ;;  %v928_v22 = vpop.f32.mrf.mxu0 }
 0x30d   :  { %v929_v23 = vadd.f32 %v1297_v7, %v928_v22 }
 0x30e   :  { %v1552_v24 = vpop.f32.mrf.mxu0 }
 0x30f   :  { %1641 = vtanh.f32 %v929_v23  ;;  %v944_v26 = vadd.f32 %v1552_v24, %v1297_v7 }
 0x310   :  { %v1630_v25 = vpop.eup %1629  ;;  %1643 = vtanh.f32 %v934_v21  ;;  %v938_v27 = vpop.f32.mrf.mxu0 }
 0x311   :  { %v1632_v28 = vpop.eup %1631  ;;  %v939_v29 = vadd.f32 %v1297_v7, %v938_v27  ;;  %1570 = vmatprep.mubr.msk.f32.mxu1 %vm74_vm0, %v1630_v25 }
 0x312   :  { %v1555_v30 = vpop.f32.mrf.mxu0  ;;  %1571 = vmatmul.mubr.msk.f32.vlgmr.msra.gmra.mxu1 %vm74_vm0, %v1632_v28 }
 0x313   :  { %1645 = vtanh.f32 %v939_v29  ;;  %v954_v32 = vadd.f32 %v1555_v30, %v1297_v7 }
 0x314   :  { %v1634_v31 = vpop.eup %1633  ;;  %1647 = vtanh.f32 %v944_v26  ;;  %v948_v33 = vpop.f32.mrf.mxu0 }
 0x315   :  { %v1636_v34 = vpop.eup %1635  ;;  %v949_v35 = vadd.f32 %v1297_v7, %v948_v33  ;;  %1573 = vmatprep.mubr.msk.f32.mxu1 %vm74_vm0, %v1634_v31 }
 0x316   :  { %v1558_v36 = vpop.f32.mrf.mxu0  ;;  %1574 = vmatmul.mubr.msk.f32.gmra.mxu1 %vm74_vm0, %v1636_v34 }
 0x317   :  { %1649 = vtanh.f32 %v949_v35  ;;  %v964_v38 = vadd.f32 %v1558_v36, %v1297_v7 }
 0x318   :  { %v1638_v37 = vpop.eup %1637  ;;  %1651 = vtanh.f32 %v954_v32  ;;  %v958_v39 = vpop.f32.mrf.mxu0 }
 0x319   :  { %v1640_v40 = vpop.eup %1639  ;;  %v959_v41 = vadd.f32 %v1297_v7, %v958_v39  ;;  %1576 = vmatprep.mubr.msk.f32.mxu1 %vm74_vm0, %v1638_v37 }
 0x31a   :  { %v1561_v42 = vpop.f32.mrf.mxu0  ;;  %1577 = vmatmul.mubr.msk.f32.gmra.mxu1 %vm74_vm0, %v1640_v40 }
 0x31b   :  { %1653 = vtanh.f32 %v959_v41  ;;  %v974_v44 = vadd.f32 %v1561_v42, %v1297_v7 }
 0x31c   :  { %v1642_v43 = vpop.eup %1641  ;;  %1655 = vtanh.f32 %v964_v38  ;;  %v968_v45 = vpop.f32.mrf.mxu0 }
 0x31d   :  { %v1644_v46 = vpop.eup %1643  ;;  %v969_v47 = vadd.f32 %v1297_v7, %v968_v45  ;;  %1579 = vmatprep.mubr.msk.f32.mxu1 %vm74_vm0, %v1642_v43 }
 0x31e   :  { %1580 = vmatmul.mubr.msk.f32.gmra.mxu1 %vm74_vm0, %v1644_v46 }
 0x31f   :  { %1657 = vtanh.f32 %v969_v47 }
 0x320   :  { %v1646_v48 = vpop.eup %1645  ;;  %1659 = vtanh.f32 %v974_v44 }
 0x321   :  { %v1648_v49 = vpop.eup %1647  ;;  %1582 = vmatprep.mubr.msk.f32.mxu1 %vm74_vm0, %v1646_v48 }
 0x322   :  { %1583 = vmatmul.mubr.msk.f32.gmra.mxu1 %vm74_vm0, %v1648_v49 }
 0x324   :  { %v1650_v50 = vpop.eup %1649 }
 0x325   :  { %v1652_v51 = vpop.eup %1651  ;;  %1585 = vmatprep.mubr.msk.f32.mxu1 %vm74_vm0, %v1650_v50 }
 0x326   :  { %1586 = vmatmul.mubr.msk.f32.gmra.mxu1 %vm74_vm0, %v1652_v51 }
 0x328   :  { %v1654_v52 = vpop.eup %1653 }
 0x329   :  { %v1656_v53 = vpop.eup %1655  ;;  %1588 = vmatprep.mubr.msk.f32.mxu1 %vm74_vm0, %v1654_v52 }
 0x32a   :  { %1589 = vmatmul.mubr.msk.f32.gmra.mxu1 %vm74_vm0, %v1656_v53 }
 0x32c   :  { %v1658_v54 = vpop.eup %1657 }
 0x32d   :  { %v1660_v55 = vpop.eup %1659  ;;  %1591 = vmatprep.mubr.msk.f32.mxu1 %vm74_vm0, %v1658_v54 }
 0x32e   :  { %1592 = vmatmul.mubr.msk.f32.gmra.mxu1 %vm74_vm0, %v1660_v55 }
 0x3d2   :  { %v1572_v56 = vpop.f32.mrf.mxu1 }
 0x3d3   :  { %v1117_v61 = vadd.f32 %v1572_v56, %v1314_v57 }
 0x3d4   :  { %v1111_v58 = vpop.f32.mrf.mxu1 }
 0x3d5   :  { %v1112_v59 = vadd.f32 %v1314_v57, %v1111_v58 }
 0x3d6   :  { %v1575_v60 = vpop.f32.mrf.mxu1 }
 0x3d7   :  { %1190 = vxpose.xlu0.b32.start [1/16] (narrow) %v1112_v59, 8  ;;  %v1127_v1 = vadd.f32 %v1575_v60, %v1314_v57 }
 0x3d8   :  { %v1121_v62 = vpop.f32.mrf.mxu1 }
 0x3d9   :  { %v1122_v63 = vadd.f32 %v1314_v57, %v1121_v62 }
 0x3da   :  { %v1578_v0 = vpop.f32.mrf.mxu1 }
 0x3db   :  { %1191 = vxpose.xlu0.b32.cont [2/16] (narrow) %v1117_v61, 8  ;;  %v1137_v5 = vadd.f32 %v1578_v0, %v1314_v57 }
 0x3dc   :  { %v1131_v2 = vpop.f32.mrf.mxu1 }
 0x3dd   :  { %v1132_v3 = vadd.f32 %v1314_v57, %v1131_v2 }
 0x3de   :  { %v1581_v4 = vpop.f32.mrf.mxu1 }
 0x3df   :  { %1192 = vxpose.xlu0.b32.cont [3/16] (narrow) %v1122_v63, 8  ;;  %v1147_v9 = vadd.f32 %v1581_v4, %v1314_v57 }
 0x3e0   :  { %v1141_v6 = vpop.f32.mrf.mxu1 }
 0x3e1   :  { %v1142_v7 = vadd.f32 %v1314_v57, %v1141_v6 }
 0x3e2   :  { %v1584_v8 = vpop.f32.mrf.mxu1 }
 0x3e3   :  { %1193 = vxpose.xlu0.b32.cont [4/16] (narrow) %v1127_v1, 8  ;;  %v1157_v13 = vadd.f32 %v1584_v8, %v1314_v57 }
 0x3e4   :  { %v1151_v10 = vpop.f32.mrf.mxu1 }
 0x3e5   :  { %v1152_v11 = vadd.f32 %v1314_v57, %v1151_v10 }
 0x3e6   :  { %v1587_v12 = vpop.f32.mrf.mxu1 }
 0x3e7   :  { %1194 = vxpose.xlu0.b32.cont [5/16] (narrow) %v1132_v3, 8  ;;  %v1167_v17 = vadd.f32 %v1587_v12, %v1314_v57 }
 0x3e8   :  { %v1161_v14 = vpop.f32.mrf.mxu1 }
 0x3e9   :  { %v1162_v15 = vadd.f32 %v1314_v57, %v1161_v14 }
 0x3ea   :  { %v1590_v16 = vpop.f32.mrf.mxu1 }
 0x3eb   :  { %1195 = vxpose.xlu0.b32.cont [6/16] (narrow) %v1137_v5, 8  ;;  %v1177_v21 = vadd.f32 %v1590_v16, %v1314_v57 }
 0x3ec   :  { %v1171_v18 = vpop.f32.mrf.mxu1 }
 0x3ed   :  { %v1172_v19 = vadd.f32 %v1314_v57, %v1171_v18 }
 0x3ee   :  { %v1593_v20 = vpop.f32.mrf.mxu1 }
 0x3ef   :  { %1196 = vxpose.xlu0.b32.cont [7/16] (narrow) %v1142_v7, 8  ;;  %v1187_v24 = vadd.f32 %v1593_v20, %v1314_v57 }
 0x3f0   :  { %v1181_v22 = vpop.f32.mrf.mxu1 }
 0x3f1   :  { %v1182_v23 = vadd.f32 %v1314_v57, %v1181_v22 }
 0x3f3   :  { %1197 = vxpose.xlu0.b32.cont [8/16] (narrow) %v1147_v9, 8 }
 0x3f7   :  { %1198 = vxpose.xlu0.b32.cont [9/16] (narrow) %v1152_v11, 8 }
 0x3fb   :  { %1199 = vxpose.xlu0.b32.cont [10/16] (narrow) %v1157_v13, 8 }
 0x3ff   :  { %1200 = vxpose.xlu0.b32.cont [11/16] (narrow) %v1162_v15, 8 }
 0x403   :  { %1201 = vxpose.xlu0.b32.cont [12/16] (narrow) %v1167_v17, 8 }
 0x407   :  { %1202 = vxpose.xlu0.b32.cont [13/16] (narrow) %v1172_v19, 8 }
 0x40b   :  { %1203 = vxpose.xlu0.b32.cont [14/16] (narrow) %v1177_v21, 8 }
 0x40f   :  { %1204 = vxpose.xlu0.b32.cont [15/16] (narrow) %v1182_v23, 8 }
 0x413   :  { %1205 = vxpose.xlu0.b32.end [16/16] (narrow) %v1187_v24, 8 }
 0x453   :  { %v1206_v25 = vpop.trf.xlu0 }
 0x454   :  { %v1223_v26 = vsub.f32 0.0, %v1206_v25  ;;  %v1222_v38 = vmax.f32 %v1206_v25, 0.0 }
 0x456   :  { %v1226_v27 = vand.u32 2147483647, %v1223_v26  ;;  %vm1224_vm5 = vcmp.ne.f32.partialorder %v1223_v26, %v1223_v26 }
 0x458   :  { %v1227_v28 = vsub.f32 0.0, %v1226_v27 }
 0x45a   :  { %v1228_v29 = vmul.f32 1.442695, %v1227_v28 }
 0x45c   :  { %1661 = vpow2.f32 %v1228_v29 }
 0x469   :  { %v1662_v30 = vpop.eup %1661 }
 0x46a   :  { %v1230_v31 = vadd.f32 1.0, %v1662_v30  ;;  %v1233_v32 = vmul.f32 -0.5, %v1662_v30  ;;  %v1236_v34 = vand.u32 2147483647, %v1662_v30 }
 0x46c   :  { %1663 = vlog2.f32 %v1230_v31  ;;  %v1234_v33 = vadd.f32 1.0, %v1233_v32  ;;  %vm1237_vm4 = vcmp.lt.f32.partialorder %v1236_v34, 0.0004427343 }
 0x46e   :  { %v1235_v37 = vmul.f32 %v1662_v30, %v1234_v33 }
 0x479   :  { %v1664_v35 = vpop.eup %1663 }
 0x47a   :  { %v1232_v36 = vmul.f32 0.6931472, %v1664_v35 }
 0x47c   :  { %v1238_v39 = vsel %vm1237_vm4, %v1235_v37, %v1232_v36 }
 0x47d   :  { %v1239_v40 = vadd.f32 %v1238_v39, %v1222_v38 }
 0x47f   :  { %v1240_v41 = vsel %vm1224_vm5, %v1206_v25, %v1239_v40 }
 0x480   :  { %1241 = vst [vmem:[%s1990_s4] sm:$0x3] %v1240_v41 }

</bundles_post_ra>
